<compile_context>
chip_gen: v7x
topology: tpu7x:2x2x1
jax: 0.10.0
libtpu: 0.0.40
codegen_flags: <defaults>
</compile_context>

<pallas_src>
import math
import functools

import jax
import jax.numpy as jnp
from jax import lax
from jax.experimental import pallas as pl
from jax.experimental.pallas import tpu as pltpu


# ---------------------------------------------------------------------------
# Hardware introspection (generation-aware sizing; safe fallbacks everywhere).
# ---------------------------------------------------------------------------
def _hw_info():
    kind = ""
    try:
        kind = jax.devices()[0].device_kind.lower()
    except Exception:
        pass
    vmem_cap = 128 << 20                      # v5e / v6e physical VMEM
    try:
        vmem_cap = int(pltpu.get_tpu_info().vmem_capacity_bytes)
    except Exception:
        if "v7" in kind:
            vmem_cap = 64 << 20               # v7x: 64 MiB per TensorCore
    two_tc = "v7" in kind                     # v7x has 2 TensorCores / chip
    # bf16 VPU/EUP exists on v6e/v7x; v5-and-older emulate bf16 elementwise.
    bf16_vpu = not any(t in kind for t in ("v2", "v3", "v4", "v5"))
    return kind, vmem_cap, two_tc, bf16_vpu


# ---------------------------------------------------------------------------
# Kernels
# ---------------------------------------------------------------------------
def _sdpa_single_tile_kernel(q_ref, k_ref, v_ref, mask_ref, ctx_ref, *attn_refs,
                             scale, scale_in_q, exp_dtype, lane_dense):
    # Blocks: q (G,Lq,Dk), k (G,Lk,Dk), v (G,Lk,Dv), mask (G,{1|Lq},Lk) int8.
    q = q_ref[...]
    if scale_in_q:                       # fold 1/sqrt(d_k) into Q (Lq*Dk muls)
        q = q * jnp.asarray(scale, dtype=q.dtype)

    # scores = Q @ K^T, contracting Dk directly (no XLU transpose of K),
    # batched over G, f32 accumulation on the MXU.
    scores = lax.dot_general(
        q, k_ref[...],
        dimension_numbers=(((2,), (2,)), ((0,), (0,))),
        preferred_element_type=jnp.float32)
    if not scale_in_q:                   # v5-family + bf16 inputs: scale in f32
        scores = scores * jnp.float32(scale)

    # masked_fill_(attn_mask, -1e9); mask broadcasts over Lq when compact.
    scores = jnp.where(mask_ref[...] != 0, jnp.float32(-1000000000.0), scores)

    # Numerically stable softmax (normalization deferred past the V matmul).
    m = jnp.max(scores, axis=-1, keepdims=True)
    x = scores - m
    if exp_dtype != jnp.float32:
        x = x.astype(exp_dtype)          # bf16 exp on v6e/v7x EUP
    e = jnp.exp(x)
    denom = jnp.sum(e.astype(jnp.float32), axis=-1, keepdims=True)
    inv = pl.reciprocal(denom, approx=True)          # EUP vrcp

    # context = softmax(scores) @ V == (e @ V) * (1/denom): normalize after
    # the matmul so the scaling is Lq*Dv instead of Lq*Lk elementwise ops.
    ctx = lax.dot_general(
        e.astype(v_ref.dtype), v_ref[...],
        dimension_numbers=(((2,), (1,)), ((0,), (0,))),
        preferred_element_type=jnp.float32)
    ctx = ctx * inv

    if lane_dense:
        # Present a >=128-lane-wide output slab: (G,Lq,Dv) -> (Lq, G*Dv).
        g, lq, dv = ctx.shape
        ctx = jnp.transpose(ctx, (1, 0, 2)).reshape(lq, g * dv)
        ctx_ref[...] = ctx[None].astype(ctx_ref.dtype)
    else:
        ctx_ref[...] = ctx.astype(ctx_ref.dtype)

    if attn_refs:                        # attn output optional
        attn_refs[0][...] = (e.astype(jnp.float32) * inv).astype(attn_refs[0].dtype)


def _sdpa_flash_kernel(q_ref, k_ref, v_ref, mask_ref, ctx_ref,
                       m_sc, l_sc, acc_sc, *, scale, scale_in_q, exp_dtype):
    # Flash-style path: grid = (BH//G, Lk//TK), online softmax, no (Lq,Lk)
    # intermediate — sized for long Lk (esp. v7x's 64 MiB VMEM).
    kj = pl.program_id(1)

    @pl.when(kj == 0)
    def _():
        m_sc[...] = jnp.full(m_sc.shape, -jnp.inf, dtype=m_sc.dtype)
        l_sc[...] = jnp.zeros(l_sc.shape, dtype=l_sc.dtype)
        acc_sc[...] = jnp.zeros(acc_sc.shape, dtype=acc_sc.dtype)

    q = q_ref[...]
    if scale_in_q:
        q = q * jnp.asarray(scale, dtype=q.dtype)
    s = lax.dot_general(
        q, k_ref[...],
        dimension_numbers=(((2,), (2,)), ((0,), (0,))),
        preferred_element_type=jnp.float32)
    if not scale_in_q:
        s = s * jnp.float32(scale)
    s = jnp.where(mask_ref[...] != 0, jnp.float32(-1000000000.0), s)

    m_prev = m_sc[...]
    m_new = jnp.maximum(m_prev, jnp.max(s, axis=-1, keepdims=True))
    alpha = jnp.exp(m_prev - m_new)
    x = s - m_new
    if exp_dtype != jnp.float32:
        x = x.astype(exp_dtype)
    p = jnp.exp(x)
    l_sc[...] = alpha * l_sc[...] + jnp.sum(p.astype(jnp.float32),
                                            axis=-1, keepdims=True)
    acc_sc[...] = alpha * acc_sc[...] + lax.dot_general(
        p.astype(v_ref.dtype), v_ref[...],
        dimension_numbers=(((2,), (1,)), ((0,), (0,))),
        preferred_element_type=jnp.float32)
    m_sc[...] = m_new

    @pl.when(kj == pl.num_programs(1) - 1)
    def _():
        inv = pl.reciprocal(l_sc[...], approx=True)
        ctx_ref[...] = (acc_sc[...] * inv).astype(ctx_ref.dtype)


# ---------------------------------------------------------------------------
# Sizing helpers
# ---------------------------------------------------------------------------
def _pick_group_size(BH, Lq, kv_len, Dk, Dv, mask_lq, elt_bytes, attn_bytes,
                     two_tc, vmem_budget_bytes):
    """Largest divisor G of BH whose full working set fits the budget."""
    # Double-buffered I/O streams per (batch*head) slice.
    io = (Lq * Dk + kv_len * Dk + kv_len * Dv + Lq * Dv) * elt_bytes
    io += mask_lq * kv_len                       # int8 mask
    if attn_bytes:
        io += Lq * kv_len * attn_bytes
    io *= 2                                      # BlockSpec double buffering
    # In-kernel f32 intermediates (NOT double buffered): scores, exp,
    # normalized/cast copy fed to the attn@V MXU, scaled q, f32 ctx/acc.
    inter = 3 * Lq * kv_len * 4 + Lq * kv_len * elt_bytes
    inter += Lq * Dk * elt_bytes + Lq * Dv * 4
    per_slice = io + inter

    g_max = max(1, vmem_budget_bytes // max(per_slice, 1))
    if two_tc and BH >= 2:
        # Keep >=2 grid steps only where there are 2 TensorCores to feed.
        g_max = min(g_max, max(1, BH // 2))
    g_max = max(1, min(g_max, BH))

    divisors = [d for d in range(1, BH + 1) if BH % d == 0 and d <= g_max]
    g = max(divisors)
    if Dv % 128 != 0:
        # Prefer a G that makes the ctx store lane-dense (G*Dv % 128 == 0),
        # as long as it does not shrink the tile by more than 4x.
        dense = [d for d in divisors if (d * Dv) % 128 == 0]
        if dense and max(dense) * 4 >= g:
            g = max(dense)
    return g, per_slice


def _pick_lk_block(Lk, requested):
    if requested is not None:
        ok = (Lk % requested == 0) and (requested % 128 == 0 or requested == Lk)
        return requested if ok else None
    for tk in (512, 256, 128):
        if Lk % tk == 0 and tk < Lk:
            return tk
    return None


# ---------------------------------------------------------------------------
# Public wrapper
# ---------------------------------------------------------------------------
def scaled_dot_product_attention(Q, K, V, attn_mask, *, return_attn=True,
                                 attn_dtype=None, flash_min_lk=1024,
                                 lk_block=None):
    """
    Q: [B,H,Lq,Dk]  K: [B,H,Lk,Dk]  V: [B,H,Lk,Dv]
    attn_mask: broadcastable to [B,H,Lq,Lk] (nonzero = masked out).
    Returns (context, attn) if return_attn else context.
    Pass attn_dtype=jnp.bfloat16 to halve the attn HBM write stream.
    """
    assert attn_mask.ndim == 4
    B, H, Lq, Dk = Q.shape
    Lk = K.shape[2]
    Dv = V.shape[3]
    BH = B * H

    _, vmem_cap, two_tc, bf16_vpu = _hw_info()

    q = Q.reshape(BH, Lq, Dk)
    k = K.reshape(BH, Lk, Dk)
    v = V.reshape(BH, Lk, Dv)

    # Keep a size-1 Lq axis of padding masks ([B,1,1,Lk] / [B,H,1,Lk]) all the
    # way into the kernel: the mask HBM read drops by a factor of Lq.
    mLq = Lq if attn_mask.shape[2] != 1 else 1
    mask = jnp.broadcast_to(attn_mask, (B, H, mLq, Lk)) \
              .reshape(BH, mLq, Lk).astype(jnp.int8)

    elt_bytes = jnp.dtype(Q.dtype).itemsize
    if attn_dtype is None:
        attn_dtype = Q.dtype
    attn_bytes = jnp.dtype(attn_dtype).itemsize if return_attn else 0

    scale = 1.0 / math.sqrt(Dk)
    # Fold 1/sqrt(d_k) into Q unless that would be an emulated bf16 multiply
    # (v5-family has no native bf16 VPU); then scale the f32 scores instead.
    scale_in_q = (Q.dtype == jnp.float32) or bf16_vpu
    # bf16 exp halves the EUP push count on v6e/v7x; keep f32 exp on v5e.
    exp_dtype = jnp.bfloat16 if (bf16_vpu and Q.dtype == jnp.bfloat16) \
        else jnp.float32

    # Generation-aware budget: ~25 MiB on 128 MiB parts, ~12 MiB on v7x.
    vmem_budget = max(4 << 20, vmem_cap // 5)

    tk = None
    if (not return_attn) and Lk >= flash_min_lk:
        tk = _pick_lk_block(Lk, lk_block)
    use_flash = tk is not None

    kv_len_step = tk if use_flash else Lk
    G, per_slice = _pick_group_size(BH, Lq, kv_len_step, Dk, Dv, mLq,
                                    elt_bytes, attn_bytes, two_tc, vmem_budget)

    est = G * per_slice
    vmem_limit = int(min(vmem_cap * 3 // 4, max(32 << 20, 2 * est + (4 << 20))))

    cost = pl.CostEstimate(
        flops=int(2 * BH * Lq * Lk * (Dk + Dv)),
        transcendentals=int(BH * Lq * Lk),
        bytes_accessed=int(q.size * elt_bytes + k.size * elt_bytes +
                           v.size * elt_bytes + mask.size +
                           BH * Lq * Dv * elt_bytes +
                           BH * Lq * Lk * attn_bytes))

    if use_flash:
        kernel = functools.partial(_sdpa_flash_kernel, scale=scale,
                                   scale_in_q=scale_in_q, exp_dtype=exp_dtype)
        ctx = pl.pallas_call(
            kernel,
            out_shape=jax.ShapeDtypeStruct((BH, Lq, Dv), Q.dtype),
            grid=(BH // G, Lk // tk),
            in_specs=[
                pl.BlockSpec((G, Lq, Dk), lambda i, j: (i, 0, 0)),
                pl.BlockSpec((G, tk, Dk), lambda i, j: (i, j, 0)),
                pl.BlockSpec((G, tk, Dv), lambda i, j: (i, j, 0)),
                pl.BlockSpec((G, mLq, tk), lambda i, j: (i, 0, j)),
            ],
            out_specs=pl.BlockSpec((G, Lq, Dv), lambda i, j: (i, 0, 0)),
            scratch_shapes=[
                pltpu.VMEM((G, Lq, 1), jnp.float32),   # running max
                pltpu.VMEM((G, Lq, 1), jnp.float32),   # running denom
                pltpu.VMEM((G, Lq, Dv), jnp.float32),  # f32 accumulator
            ],
            compiler_params=pltpu.CompilerParams(
                dimension_semantics=("parallel", "arbitrary"),
                vmem_limit_bytes=vmem_limit),
            cost_estimate=cost,
        )(q, k, v, mask)
        return ctx.reshape(B, H, Lq, Dv)

    # ---- single-tile-per-head path (BERT-scale Lq/Lk, or attn requested) ----
    lane_dense = (Dv % 128 != 0) and G > 1 and ((G * Dv) % 128 == 0)

    kernel = functools.partial(_sdpa_single_tile_kernel, scale=scale,
                               scale_in_q=scale_in_q, exp_dtype=exp_dtype,
                               lane_dense=lane_dense)

    if lane_dense:
        ctx_shape = jax.ShapeDtypeStruct((BH // G, Lq, G * Dv), Q.dtype)
        ctx_spec = pl.BlockSpec((1, Lq, G * Dv), lambda i: (i, 0, 0))
    else:
        ctx_shape = jax.ShapeDtypeStruct((BH, Lq, Dv), Q.dtype)
        ctx_spec = pl.BlockSpec((G, Lq, Dv), lambda i: (i, 0, 0))

    out_shape = [ctx_shape]
    out_specs = [ctx_spec]
    if return_attn:
        out_shape.append(jax.ShapeDtypeStruct((BH, Lq, Lk), attn_dtype))
        out_specs.append(pl.BlockSpec((G, Lq, Lk), lambda i: (i, 0, 0)))

    outs = pl.pallas_call(
        kernel,
        out_shape=tuple(out_shape),
        grid=(BH // G,),
        in_specs=[
            pl.BlockSpec((G, Lq, Dk), lambda i: (i, 0, 0)),
            pl.BlockSpec((G, Lk, Dk), lambda i: (i, 0, 0)),
            pl.BlockSpec((G, Lk, Dv), lambda i: (i, 0, 0)),
            pl.BlockSpec((G, mLq, Lk), lambda i: (i, 0, 0)),
        ],
        out_specs=tuple(out_specs),
        compiler_params=pltpu.CompilerParams(
            dimension_semantics=("parallel",),
            vmem_limit_bytes=vmem_limit),
        cost_estimate=cost,
    )(q, k, v, mask)

    ctx = outs[0]
    if lane_dense:
        ctx = ctx.reshape(BH // G, Lq, G, Dv)
        ctx = jnp.transpose(ctx, (0, 2, 1, 3))
    context = ctx.reshape(B, H, Lq, Dv)
    if return_attn:
        return context, outs[1].reshape(B, H, Lq, Lk)
    return context


# ---------------------------------------------------------------------------
# Reference & tests
# ---------------------------------------------------------------------------
def _reference(Q, K, V, attn_mask):
    d_k = Q.shape[-1]
    scores = jnp.einsum("bhqd,bhkd->bhqk", Q, K) / math.sqrt(d_k)
    scores = jnp.where(attn_mask, -1000000000.0, scores)
    attn = jax.nn.softmax(scores, axis=-1)
    context = jnp.einsum("bhqk,bhkv->bhqv", attn, V)
    return context, attn


if __name__ == "__main__":
    key = jax.random.PRNGKey(0)

    # 1) Full [B,H,Lq,Lk] mask, f32, context + attention (lane-dense ctx path).
    B, H, Lq, Lk, Dk, Dv = 2, 4, 8, 8, 32, 32
    kq, kk, kv, km = jax.random.split(key, 4)
    Q = jax.random.normal(kq, (B, H, Lq, Dk), dtype=jnp.float32)
    K = jax.random.normal(kk, (B, H, Lk, Dk), dtype=jnp.float32)
    V = jax.random.normal(kv, (B, H, Lk, Dv), dtype=jnp.float32)
    attn_mask = jax.random.bernoulli(km, p=0.3, shape=(B, H, Lq, Lk))
    attn_mask = attn_mask.at[..., 0].set(False)   # >=1 unmasked key per row

    context, attn = scaled_dot_product_attention(Q, K, V, attn_mask)
    jax.block_until_ready((context, attn))
    ref_ctx, ref_attn = _reference(Q, K, V, attn_mask)
    assert context.shape == (B, H, Lq, Dv)
    assert attn.shape == (B, H, Lq, Lk)
    # Tolerance accounts for the EUP approximate reciprocal in the softmax.
    assert jnp.allclose(context, ref_ctx, atol=2e-3, rtol=2e-3)
    assert jnp.allclose(attn, ref_attn, atol=2e-3, rtol=2e-3)

    # 2) Compact BERT padding mask [B,1,1,Lk], context-only path.
    pad_mask = jax.random.bernoulli(jax.random.PRNGKey(1), p=0.25,
                                    shape=(B, 1, 1, Lk))
    pad_mask = pad_mask.at[..., 0].set(False)
    ctx_only = scaled_dot_product_attention(Q, K, V, pad_mask, return_attn=False)
    jax.block_until_ready(ctx_only)
    ref_ctx2, _ = _reference(Q, K, V, pad_mask)
    assert jnp.allclose(ctx_only, ref_ctx2, atol=2e-3, rtol=2e-3)

    # 3) Flash-style Lk-tiled path with online softmax (context-only).
    B2, H2, Lq2, Lk2, D2 = 1, 2, 128, 256, 32
    k2 = jax.random.split(jax.random.PRNGKey(2), 4)
    Q2 = jax.random.normal(k2[0], (B2, H2, Lq2, D2), dtype=jnp.float32)
    K2 = jax.random.normal(k2[1], (B2, H2, Lk2, D2), dtype=jnp.float32)
    V2 = jax.random.normal(k2[2], (B2, H2, Lk2, D2), dtype=jnp.float32)
    pad2 = jax.random.bernoulli(k2[3], p=0.2, shape=(B2, 1, 1, Lk2))
    pad2 = pad2.at[..., 0].set(False)
    ctx_flash = scaled_dot_product_attention(Q2, K2, V2, pad2,
                                             return_attn=False,
                                             flash_min_lk=256, lk_block=128)
    jax.block_until_ready(ctx_flash)
    ref_ctx3, _ = _reference(Q2, K2, V2, pad2)
    assert jnp.allclose(ctx_flash, ref_ctx3, atol=2e-3, rtol=2e-3)

    # 4) bf16 inputs (exercises bf16 MXU feed; bf16 exp on v6e/v7x).
    Qb, Kb, Vb = (x.astype(jnp.bfloat16) for x in (Q, K, V))
    ctx_bf16 = scaled_dot_product_attention(Qb, Kb, Vb, attn_mask,
                                            return_attn=False)
    jax.block_until_ready(ctx_bf16)
    assert jnp.allclose(ctx_bf16.astype(jnp.float32), ref_ctx,
                        atol=1e-1, rtol=1e-1)

    print("KERNEL_OK")
</pallas_src>

<mosaic_0001>
module attributes {stable_mosaic.version = 11 : i64} {
  func.func @_sdpa_single_tile_kernel(%arg0: i32, %arg1: memref<8x8x32xf32, #tpu.memory_space<vmem>>, %arg2: memref<8x8x32xf32, #tpu.memory_space<vmem>>, %arg3: memref<8x8x32xf32, #tpu.memory_space<vmem>>, %arg4: memref<8x8x8xi8, #tpu.memory_space<vmem>>, %arg5: memref<1x8x256xf32, #tpu.memory_space<vmem>>, %arg6: memref<8x8x8xf32, #tpu.memory_space<vmem>>) attributes {dimension_semantics = [#tpu.dimension_semantics<parallel>], iteration_bounds = array<i64: 1>, scalar_prefetch = 0 : i64, scratch_operands = 0 : i64, tpu.core_type = #tpu.core_type<tc>, window_params = [{transform_indices = @transform_0, window_bounds = array<i64: 8, 8, 32>}, {transform_indices = @transform_1, window_bounds = array<i64: 8, 8, 32>}, {transform_indices = @transform_2, window_bounds = array<i64: 8, 8, 32>}, {transform_indices = @transform_3, window_bounds = array<i64: 8, 8, 8>}, {transform_indices = @transform_4, window_bounds = array<i64: 1, 8, 256>}, {transform_indices = @transform_5, window_bounds = array<i64: 8, 8, 8>}]} {
    %c0 = arith.constant 0 : index
    %c0_0 = arith.constant 0 : index
    %c0_1 = arith.constant 0 : index
    %0 = vector.load %arg1[%c0, %c0_0, %c0_1] : memref<8x8x32xf32, #tpu.memory_space<vmem>>, vector<8x8x32xf32>
    %cst = arith.constant 0.176776692 : f32
    %1 = vector.broadcast %cst : f32 to vector<8x8x32xf32>
    %2 = arith.mulf %0, %1 : vector<8x8x32xf32>
    %c0_2 = arith.constant 0 : index
    %c0_3 = arith.constant 0 : index
    %c0_4 = arith.constant 0 : index
    %3 = vector.load %arg2[%c0_2, %c0_3, %c0_4] : memref<8x8x32xf32, #tpu.memory_space<vmem>>, vector<8x8x32xf32>
    %cst_5 = arith.constant dense<0.000000e+00> : vector<8x8x8xf32>
    %4 = tpu.matmul %2, %3, %cst_5 {dimension_numbers = #tpu.dot_dimension_numbers<[2], [2], [1], [1], [0, 0, 0, 1, 1, 1], [0], [0]>} : vector<8x8x32xf32>, vector<8x8x32xf32>, vector<8x8x8xf32> -> vector<8x8x8xf32>
    %c0_6 = arith.constant 0 : index
    %c0_7 = arith.constant 0 : index
    %c0_8 = arith.constant 0 : index
    %5 = vector.load %arg4[%c0_6, %c0_7, %c0_8] : memref<8x8x8xi8, #tpu.memory_space<vmem>>, vector<8x8x8xi8>
    %c0_i8 = arith.constant 0 : i8
    %6 = vector.broadcast %c0_i8 : i8 to vector<8x8x8xi8>
    %7 = arith.cmpi ne, %5, %6 : vector<8x8x8xi8>
    %cst_9 = arith.constant -1.000000e+09 : f32
    %8 = vector.broadcast %cst_9 : f32 to vector<8x8x8xf32>
    %9 = arith.select %7, %8, %4 : vector<8x8x8xi1>, vector<8x8x8xf32>
    %cst_10 = arith.constant dense<0xFF800000> : vector<8x8xf32>
    %10 = vector.multi_reduction <maximumf>, %9, %cst_10 [2] : vector<8x8x8xf32> to vector<8x8xf32>
    %11 = vector.shape_cast %10 : vector<8x8xf32> to vector<8x8x1xf32>
    %12 = vector.broadcast %11 : vector<8x8x1xf32> to vector<8x8x8xf32>
    %13 = arith.subf %9, %12 : vector<8x8x8xf32>
    %14 = math.exp %13 : vector<8x8x8xf32>
    %cst_11 = arith.constant dense<0.000000e+00> : vector<8x8xf32>
    %15 = vector.multi_reduction <add>, %14, %cst_11 [2] : vector<8x8x8xf32> to vector<8x8xf32>
    %16 = vector.shape_cast %15 : vector<8x8xf32> to vector<8x8x1xf32>
    %17 = tpu.reciprocal %16 {approx = true} : vector<8x8x1xf32> -> vector<8x8x1xf32>
    %c0_12 = arith.constant 0 : index
    %c0_13 = arith.constant 0 : index
    %c0_14 = arith.constant 0 : index
    %18 = vector.load %arg3[%c0_12, %c0_13, %c0_14] : memref<8x8x32xf32, #tpu.memory_space<vmem>>, vector<8x8x32xf32>
    %cst_15 = arith.constant dense<0.000000e+00> : vector<8x8x32xf32>
    %19 = tpu.matmul %14, %18, %cst_15 {dimension_numbers = #tpu.dot_dimension_numbers<[2], [1], [1], [2], [0, 0, 0, 1, 1, 2], [0], [0]>} : vector<8x8x8xf32>, vector<8x8x32xf32>, vector<8x8x32xf32> -> vector<8x8x32xf32>
    %20 = vector.broadcast %17 : vector<8x8x1xf32> to vector<8x8x32xf32>
    %21 = arith.mulf %19, %20 : vector<8x8x32xf32>
    %22 = tpu.transpose %21, [1, 0, 2] : vector<8x8x32xf32> -> vector<8x8x32xf32>
    %23 = vector.shape_cast %22 : vector<8x8x32xf32> to vector<8x256xf32>
    %24 = vector.shape_cast %23 : vector<8x256xf32> to vector<1x8x256xf32>
    %c0_16 = arith.constant 0 : index
    %c0_17 = arith.constant 0 : index
    %c0_18 = arith.constant 0 : index
    %25 = vector.load %arg5[%c0_16, %c0_17, %c0_18] : memref<1x8x256xf32, #tpu.memory_space<vmem>>, vector<1x8x256xf32>
    tpu.vector_store %arg5[%c0_16, %c0_17, %c0_18], %24 {strides = array<i32>} : memref<1x8x256xf32, #tpu.memory_space<vmem>>, vector<1x8x256xf32>,
    %26 = vector.broadcast %17 : vector<8x8x1xf32> to vector<8x8x8xf32>
    %27 = arith.mulf %14, %26 : vector<8x8x8xf32>
    %c0_19 = arith.constant 0 : index
    %c0_20 = arith.constant 0 : index
    %c0_21 = arith.constant 0 : index
    %28 = vector.load %arg6[%c0_19, %c0_20, %c0_21] : memref<8x8x8xf32, #tpu.memory_space<vmem>>, vector<8x8x8xf32>
    tpu.vector_store %arg6[%c0_19, %c0_20, %c0_21], %27 {strides = array<i32>} : memref<8x8x8xf32, #tpu.memory_space<vmem>>, vector<8x8x8xf32>,
    return
  }
  func.func @transform_0(%arg0: i32) -> (i32, i32, i32) {
    %c0_i32 = arith.constant 0 : i32
    %c0_i32_0 = arith.constant 0 : i32
    %c0_i32_1 = arith.constant 0 : i32
    return %arg0, %c0_i32, %c0_i32_0 : i32, i32, i32
  }
  func.func @transform_1(%arg0: i32) -> (i32, i32, i32) {
    %c0_i32 = arith.constant 0 : i32
    %c0_i32_0 = arith.constant 0 : i32
    %c0_i32_1 = arith.constant 0 : i32
    return %arg0, %c0_i32, %c0_i32_0 : i32, i32, i32
  }
  func.func @transform_2(%arg0: i32) -> (i32, i32, i32) {
    %c0_i32 = arith.constant 0 : i32
    %c0_i32_0 = arith.constant 0 : i32
    %c0_i32_1 = arith.constant 0 : i32
    return %arg0, %c0_i32, %c0_i32_0 : i32, i32, i32
  }
  func.func @transform_3(%arg0: i32) -> (i32, i32, i32) {
    %c0_i32 = arith.constant 0 : i32
    %c0_i32_0 = arith.constant 0 : i32
    %c0_i32_1 = arith.constant 0 : i32
    return %arg0, %c0_i32, %c0_i32_0 : i32, i32, i32
  }
  func.func @transform_4(%arg0: i32) -> (i32, i32, i32) {
    %c0_i32 = arith.constant 0 : i32
    %c0_i32_0 = arith.constant 0 : i32
    %c0_i32_1 = arith.constant 0 : i32
    return %arg0, %c0_i32, %c0_i32_0 : i32, i32, i32
  }
  func.func @transform_5(%arg0: i32) -> (i32, i32, i32) {
    %c0_i32 = arith.constant 0 : i32
    %c0_i32_0 = arith.constant 0 : i32
    %c0_i32_1 = arith.constant 0 : i32
    return %arg0, %c0_i32, %c0_i32_0 : i32, i32, i32
  }
}

</mosaic_0001>

<bundles_post_ra>
// kernel: tpu_custom_call.1
= control target key start
LH: loop header
LB: loop body
LE: loop exit
PB: predicated region body
PF: predicated region fallthrough
CT: control target
= control target key end

     0   :  { %11 = vsyncpa [#allocation3], 0  ;;  %s2436_s0 = inlined_call_operand.hbm [shape: f32[8,8,32], index: 0, kind: input, shape index: {}]   ;;  %s2437_s1 = inlined_call_operand.hbm [shape: f32[8,8,32], index: 1, kind: input, shape index: {}]   ;;  %s2438_s2 = inlined_call_operand.hbm [shape: f32[8,8,32], index: 2, kind: input, shape index: {}]   ;;  %s2439_s3 = inlined_call_operand.hbm [shape: s8[8,8,8], index: 3, kind: input, shape index: {}]   ;;  %s2440_s4 = inlined_call_operand.hbm [shape: f32[1,8,256], index: 4, kind: output, shape index: {0}]   ;;  %s2441_s5 = inlined_call_operand.hbm [shape: f32[8,8,8], index: 5, kind: output, shape index: {1}]  }
   0x1   :  { %12 = vsyncpa [#allocation6], 0 }
   0x2   :  { %13 = vsyncpa [#allocation9], 0 }
   0x3   :  { %14 = vsyncpa [#allocation4], 0 }
   0x4   :  { %15 = vsyncpa [#allocation12], 0  ;;  %s2130_s18 = smov [#allocation5]   ;;  %s2131_s20 = smov [#allocation2]  }
   0x5   :  { %s33_s19 = sshll.u32 %s2130_s18, 4  ;;  %s21_s21 = sshll.u32 %s2131_s20, 4  ;;  %s34_s19 = int_to_ptr.vmem [resolvable:$true] %s33_s19  ;;  %s2177_s21 = int_to_ptr.vmem [resolvable:$true] %s21_s21 }
   0x6   :  { %s1988_s24 = scalar_lea.hbm %s2437_s1, 1024 }
   0x7   :  { %p1989_p0 = scmp.ne.s32.totalorder %s2437_s1, %s1988_s24  ;;  %p1992_p1 = scmp.lt.u32.totalorder %s1988_s24, %s2437_s1 }
   0x9   :  { %p1994_p2 = pnand %p1992_p1, %p1989_p0 }
   0xb   :  { %1997 = shalt.err (!%p1994_p2)
}
   0xc   :  { %s1998_s29 = scalar_lea.vmem %s34_s19, 1024  ;;  %p2003_p4 = scmp.lt.s32.totalorder %s34_s19, %s34_s19 }
   0xd   :  { %p1999_p3 = scmp.ne.s32.totalorder %s34_s19, %s1998_s29  ;;  %p2004_p5 = scmp.lt.s32.totalorder %s1998_s29, %s1998_s29 }
   0xf   :  { %p2005_p6 = por %p2004_p5, %p2003_p4 }
  0x11   :  { %p2006_p7 = pnand %p2005_p6, %p1999_p3 }
  0x13   :  { %2009 = shalt.err (!%p2006_p7)
}
  0x14   :  { %s2132_s30 = smov 128   ;;  %s2133_s6 = smov 8  }
  0x15   :  { %39 = dma.hbm_to_vmem [thread:$0]  %s2437_s1, 1024, %s34_s19, [#allocation6], %s2132_s30, %s2132_s30, %s2133_s6  }
  0x16   :  { %s2010_s11 = scalar_lea.hbm %s2436_s0, 1024 }
  0x17   :  { %p2011_p8 = scmp.ne.s32.totalorder %s2436_s0, %s2010_s11  ;;  %p2014_p9 = scmp.lt.u32.totalorder %s2010_s11, %s2436_s0 }
  0x19   :  { %p2016_p10 = pnand %p2014_p9, %p2011_p8 }
  0x1b   :  { %2019 = shalt.err (!%p2016_p10)
}
  0x1c   :  { %s2020_s16 = scalar_lea.vmem %s2177_s21, 1024  ;;  %p2025_p12 = scmp.lt.s32.totalorder %s2177_s21, %s2177_s21 }
  0x1d   :  { %p2021_p11 = scmp.ne.s32.totalorder %s2177_s21, %s2020_s16  ;;  %p2026_p13 = scmp.lt.s32.totalorder %s2020_s16, %s2020_s16 }
  0x1f   :  { %p2027_p0 = por %p2026_p13, %p2025_p12 }
  0x21   :  { %p2028_p1 = pnand %p2027_p0, %p2021_p11 }
  0x23   :  { %2031 = shalt.err (!%p2028_p1)
}
  0x24   :  { %27 = dma.hbm_to_vmem [thread:$0]  %s2436_s0, 1024, %s2177_s21, [#allocation3], %s2132_s30, %s2132_s30, %s2133_s6  }
  0x25   :  { %s2134_s18 = smov [#allocation7]   ;;  %s2135_s20 = smov [#allocation8]  }
  0x26   :  { %s45_s19 = sshll.u32 %s2134_s18, 4  ;;  %s57_s22 = sshll.u32 %s2135_s20, 4  ;;  %s46_s19 = int_to_ptr.vmem [resolvable:$true] %s45_s19  ;;  %s2214_s22 = int_to_ptr.vmem [resolvable:$true] %s57_s22 }
  0x27   :  { %s2032_s25 = scalar_lea.hbm %s2438_s2, 1024 }
  0x28   :  { %p2033_p2 = scmp.ne.s32.totalorder %s2438_s2, %s2032_s25  ;;  %p2036_p3 = scmp.lt.u32.totalorder %s2032_s25, %s2438_s2 }
  0x2a   :  { %p2038_p4 = pnand %p2036_p3, %p2033_p2 }
  0x2c   :  { %2041 = shalt.err (!%p2038_p4)
}
  0x2d   :  { %s2042_s0 = scalar_lea.vmem %s46_s19, 1024  ;;  %p2047_p6 = scmp.lt.s32.totalorder %s46_s19, %s46_s19 }
  0x2e   :  { %p2043_p5 = scmp.ne.s32.totalorder %s46_s19, %s2042_s0  ;;  %p2048_p7 = scmp.lt.s32.totalorder %s2042_s0, %s2042_s0 }
  0x30   :  { %p2049_p8 = por %p2048_p7, %p2047_p6 }
  0x32   :  { %p2050_p9 = pnand %p2049_p8, %p2043_p5 }
  0x34   :  { %2053 = shalt.err (!%p2050_p9)
}
  0x35   :  { %51 = dma.hbm_to_vmem [thread:$0]  %s2438_s2, 1024, %s46_s19, [#allocation6], %s2132_s30, %s2132_s30, %s2133_s6  }
  0x36   :  { %s2054_s10 = scalar_lea.hbm %s2439_s3, 256 }
  0x37   :  { %p2055_p10 = scmp.ne.s32.totalorder %s2439_s3, %s2054_s10  ;;  %p2058_p11 = scmp.lt.u32.totalorder %s2054_s10, %s2439_s3 }
  0x39   :  { %p2060_p12 = pnand %p2058_p11, %p2055_p10 }
  0x3b   :  { %2063 = shalt.err (!%p2060_p12)
}
  0x3c   :  { %s2064_s15 = scalar_lea.vmem %s2214_s22, 256  ;;  %p2069_p0 = scmp.lt.s32.totalorder %s2214_s22, %s2214_s22 }
  0x3d   :  { %p2065_p13 = scmp.ne.s32.totalorder %s2214_s22, %s2064_s15  ;;  %p2070_p1 = scmp.lt.s32.totalorder %s2064_s15, %s2064_s15 }
  0x3f   :  { %p2071_p2 = por %p2070_p1, %p2069_p0 }
  0x41   :  { %p2072_p3 = pnand %p2071_p2, %p2065_p13 }
  0x43   :  { %2075 = shalt.err (!%p2072_p3)
}
  0x44   :  { %s2136_s2 = smov 32   ;;  %s2137_s16 = smov 2  }
  0x45   :  { %63 = dma.hbm_to_vmem [thread:$0]  %s2439_s3, 256, %s2214_s22, [#allocation9], %s2136_s2, %s2136_s2, %s2137_s16  }
  0x46   :  { %2120 = dma.done.wait [#allocation3], 1024  }
  0x47   :  { %2121 = vsyncadd [#allocation3], 4294966272 }
  0x48   :  { %2122 = dma.done.wait [#allocation6], 2048  }
  0x49   :  { %2123 = vsyncadd [#allocation6], 4294965248 }
  0x4a   :  { %2124 = dma.done.wait [#allocation9], 256  }
  0x4b   :  { %2125 = vsyncadd [#allocation9], 4294967040  ;;  %v2138_v0 = vmov 0.0   ;;  %vm2139_vm0 = vmmov 0   ;;  %vm102_vm1 = vcmask 261120   ;;  %v94_v1 = vld [vmem:[#allocation5] sm:$0xff] }
  0x4c   :  { %1859 = vmatprep.subr.mxu0 %v2138_v0  ;;  %1861 = vmatprep.mubr.msk.f32.mxu0 %vm2139_vm0, %v2138_v0  ;;  %v78_v2 = vld [vmem:[#allocation2] sm:$0xff]  ;;  %v95_v3 = vld [vmem:[#allocation5 + $0x8] sm:$0xff]  ;;  %v80_v6 = vld [vmem:[#allocation2 + $0x10] sm:$0xff]  ;;  %v2140_v28 = vmov 0   ;;  %vm759_vm10 = vcmask 64512   ;;  %s2143_s3 = smov 64  }
  0x4d   :  { %1864 = vmatprep.subr.mxu1 %v2138_v0  ;;  %1866 = vmatprep.mubr.msk.f32.mxu1 %vm2139_vm0, %v2138_v0  ;;  %v86_v4 = vmul.f32 0.17677669, %v78_v2  ;;  %v79_v5 = vld [vmem:[#allocation2 + $0x8] sm:$0xff]  ;;  %v96_v7 = vld [vmem:[#allocation5 + $0x10] sm:$0xff]  ;;  %v97_v9 = vld [vmem:[#allocation5 + $0x18] sm:$0xff]  ;;  %s2144_s18 = smov 96  }
  0x4e   :  { %1860 = vmatpush3.xpose.msk.msra.mxu0 %vm102_vm1, %v94_v1  ;;  %1865 = vmatpush3.xpose.msk.msra.mxu1 %vm102_vm1, %v95_v3  ;;  %v87_v8 = vmul.f32 0.17677669, %v79_v5  ;;  %v81_v10 = vld [vmem:[#allocation2 + $0x18] sm:$0xff]  ;;  %v88_v11 = vmul.f32 0.17677669, %v80_v6  ;;  %v82_v12 = vld [vmem:[#allocation2 + $0x20] sm:$0xff] }
  0x4f   :  { %1869 = vmatprep.subr.mxu0 %v2138_v0  ;;  %1874 = vmatprep.subr.mxu1 %v2138_v0  ;;  %v98_v13 = vld [vmem:[#allocation5 + $0x20] sm:$0xff]  ;;  %v89_v14 = vmul.f32 0.17677669, %v81_v10  ;;  %v83_v15 = vld [vmem:[#allocation2 + $0x28] sm:$0xff]  ;;  %v90_v16 = vmul.f32 0.17677669, %v82_v12 }
  0x50   :  { %v99_v17 = vld [vmem:[#allocation5 + $0x28] sm:$0xff]  ;;  %v84_v18 = vld [vmem:[#allocation2 + $0x30] sm:$0xff]  ;;  %v91_v20 = vmul.f32 0.17677669, %v83_v15  ;;  %v85_v21 = vld [vmem:[#allocation2 + $0x38] sm:$0xff]  ;;  %s2145_s19 = smov [#allocation11]  }
  0x51   :  { %1862 = vmatmul.mubr.msk.f32.vlgmr.msra.gmra.mrb[0].mxu0 %vm102_vm1, %v86_v4  ;;  %1867 = vmatmul.mubr.msk.f32.vlgmr.msra.gmra.mrb[0].mxu1 %vm102_vm1, %v87_v8  ;;  %v100_v19 = vld [vmem:[#allocation5 + $0x30] sm:$0xff]  ;;  %v92_v22 = vmul.f32 0.17677669, %v84_v18  ;;  %v101_v23 = vld [vmem:[#allocation5 + $0x38] sm:$0xff]  ;;  %v93_v24 = vmul.f32 0.17677669, %v85_v21 }
  0x52   :  { %1870 = vmatpush3.xpose.msk.msra.mxu0 %vm102_vm1, %v96_v7  ;;  %1871 = vmatprep.mubr.msk.f32.mxu0 %vm2139_vm0, %v2138_v0  ;;  %v711_v25 = vld [vmem:[#allocation8] sm:$0x3]  ;;  %v712_v26 = vld [vmem:[#allocation8 + $0x2] sm:$0x3]  ;;  %v713_v27 = vld [vmem:[#allocation8 + $0x4] sm:$0x3] }
  0x53   :  { %1879 = vmatprep.subr.mxu0 %v2138_v0  ;;  %1875 = vmatpush3.xpose.msk.msra.mxu1 %vm102_vm1, %v97_v9  ;;  %vm719_vm2 = vnez %v711_v25  ;;  %vm720_vm3 = vnez %v712_v26  ;;  %v714_v31 = vld [vmem:[#allocation8 + $0x6] sm:$0x3]  ;;  %vm721_vm4 = vnez %v713_v27  ;;  %v715_v32 = vld [vmem:[#allocation8 + $0x8] sm:$0x3]  ;;  %v716_v35 = vld [vmem:[#allocation8 + $0xa] sm:$0x3] }
  0x54   :  { %1876 = vmatprep.mubr.msk.f32.mxu1 %vm2139_vm0, %v2138_v0  ;;  %1884 = vmatprep.subr.mxu1 %v2138_v0  ;;  %v727_v29 = vsel %vm719_vm2, 16843009, %v2140_v28  ;;  %v728_v30 = vsel %vm720_vm3, 16843009, %v2140_v28  ;;  %vm722_vm5 = vnez %v714_v31  ;;  %v729_v36 = vsel %vm721_vm4, 16843009, %v2140_v28 }
  0x55   :  { %1872 = vmatmul.mubr.msk.f32.vlgmr.msra.gmra.mrb[2].mxu0 %vm102_vm1, %v88_v11  ;;  %v735_v33 = vunpack.c.0.s8 %v727_v29  ;;  %v736_v34 = vunpack.c.0.s8 %v728_v30  ;;  %vm723_vm6 = vnez %v715_v32  ;;  %v730_v37 = vsel %vm722_vm5, 16843009, %v2140_v28  ;;  %v717_v38 = vld [vmem:[#allocation8 + $0xc] sm:$0x3]  ;;  %v718_v41 = vld [vmem:[#allocation8 + $0xe] sm:$0x3] }
  0x56   :  { %1880 = vmatpush3.xpose.msk.msra.mxu0 %vm102_vm1, %v98_v13  ;;  %1881 = vmatprep.mubr.msk.f32.mxu0 %vm2139_vm0, %v2138_v0  ;;  %vm724_vm7 = vnez %v716_v35  ;;  %v737_v39 = vunpack.c.0.s8 %v729_v36  ;;  %v731_v40 = vsel %vm723_vm6, 16843009, %v2140_v28  ;;  %v738_v44 = vunpack.c.0.s8 %v730_v37  ;;  %s1777_s20 = sshll.u32 %s2145_s19, 4  ;;  %s1778_s20 = int_to_ptr.vmem [resolvable:$true] %s1777_s20 }
  0x57   :  { %1877 = vmatmul.mubr.msk.f32.vlgmr.msra.gmra.mrb[2].mxu1 %vm102_vm1, %v89_v14  ;;  %1889 = vmatprep.subr.mxu0 %v2138_v0  ;;  %vm743_vm8 = vcmp.ne.s32.totalorder %v735_v33, 0  ;;  %vm744_vm9 = vcmp.ne.s32.totalorder %v736_v34, 0  ;;  %v732_v45 = vsel %vm724_vm7, 16843009, %v2140_v28  ;;  %vm725_vm11 = vnez %v717_v38  ;;  %s2076_s22 = scalar_lea.vmem %s1778_s20, 1024  ;;  %p2081_p5 = scmp.lt.s32.totalorder %s1778_s20, %s1778_s20 }
  0x58   :  { %1885 = vmatpush3.xpose.msk.msra.mxu1 %vm102_vm1, %v99_v17  ;;  %1886 = vmatprep.mubr.msk.f32.mxu1 %vm2139_vm0, %v2138_v0  ;;  %vm745_vm12 = vcmp.ne.s32.totalorder %v737_v39, 0  ;;  %v739_v51 = vunpack.c.0.s8 %v731_v40  ;;  %vm726_vm13 = vnez %v718_v41  ;;  %v733_v52 = vsel %vm725_vm11, 16843009, %v2140_v28  ;;  %v842_v40 = vld [vmem:[#allocation7 + $0x10] sm:$0xff]  ;;  %p2077_p4 = scmp.ne.s32.totalorder %s1778_s20, %s2076_s22  ;;  %p2082_p6 = scmp.lt.s32.totalorder %s2076_s22, %s2076_s22 }
  0x59   :  { %1882 = vmatmul.mubr.msk.f32.vlgmr.msra.gmra.mrb[4].mxu0 %vm102_vm1, %v90_v16  ;;  %1894 = vmatprep.subr.mxu1 %v2138_v0  ;;  %vm746_vm14 = vcmp.ne.s32.totalorder %v738_v44, 0  ;;  %v740_v55 = vunpack.c.0.s8 %v732_v45  ;;  %v734_v58 = vsel %vm726_vm13, 16843009, %v2140_v28  ;;  %v741_v61 = vunpack.c.0.s8 %v733_v52  ;;  %v844_v52 = vld [vmem:[#allocation7 + $0x20] sm:$0xff] }
  0x5a   :  { %1890 = vmatpush3.xpose.msk.msra.mxu0 %vm102_vm1, %v100_v19  ;;  %1891 = vmatprep.mubr.msk.f32.mxu0 %vm2139_vm0, %v2138_v0  ;;  %vm747_vm15 = vcmp.ne.s32.totalorder %v739_v51, 0  ;;  %v742_v3 = vunpack.c.0.s8 %v734_v58  ;;  %v840_v19 = vld [vmem:[#allocation7] sm:$0xff]  ;;  %p2083_p7 = por %p2082_p6, %p2081_p5 }
  0x5b   :  { %1887 = vmatmul.mubr.msk.f32.vlgmr.msra.gmra.mrb[4].mxu1 %vm102_vm1, %v91_v20  ;;  %1899 = vmatprep.subr.mxu0 %v2138_v0  ;;  %vm748_vm2 = vcmp.ne.s32.totalorder %v740_v55, 0  ;;  %vm749_vm3 = vcmp.ne.s32.totalorder %v741_v61, 0  ;;  %v841_v20 = vld [vmem:[#allocation7 + $0x8] sm:$0xff] }
  0x5c   :  { %1895 = vmatpush3.xpose.msk.msra.mxu1 %vm102_vm1, %v101_v23  ;;  %1896 = vmatprep.mubr.msk.f32.mxu1 %vm2139_vm0, %v2138_v0  ;;  %vm750_vm4 = vcmp.ne.s32.totalorder %v742_v3, 0  ;;  %v845_v55 = vld [vmem:[#allocation7 + $0x28] sm:$0xff]  ;;  %p2084_p8 = pnand %p2083_p7, %p2077_p4 }
  0x5d   :  { %1892 = vmatmul.mubr.msk.f32.vlgmr.msra.gmra.mrb[6].mxu0 %vm102_vm1, %v92_v22  ;;  %1904 = vmatprep.subr.mxu1 %v2138_v0 }
  0x5e   :  { %1901 = vmatprep.mubr.msk.f32.mxu0 %vm2139_vm0, %v2138_v0  ;;  %1900 = vmatpush3.msra.mxu0 %v840_v19 }
  0x5f   :  { %1897 = vmatmul.mubr.msk.f32.vlgmr.msra.gmra.mrb[6].mxu1 %vm102_vm1, %v93_v24  ;;  %1909 = vmatprep.subr.mxu0 %v2138_v0 }
  0x60   :  { %1906 = vmatprep.mubr.msk.f32.mxu1 %vm2139_vm0, %v2138_v0  ;;  %1905 = vmatpush3.msra.mxu1 %v841_v20 }
  0x61   :  { %1914 = vmatprep.subr.mxu1 %v2138_v0 }
 0x124   :  { %v175_v42 = vpop.f32.mrb[0].mxu0  ;;  %v251_v43 = vpop.f32.mrb[0].mxu1 }
 0x125   :  { %v751_v46 = vsel %vm743_vm8, -1e+09, %v175_v42  ;;  %v1863_v47 = vpop.f32.mrb[1].mxu0  ;;  %v2296_v48 = vsel %vm744_vm9, -1e+09, %v251_v43  ;;  %v1868_v49 = vpop.f32.mrb[1].mxu1 }
 0x126   :  { %v760_v50 = vsel %vm759_vm10, %v751_v46, -inf  ;;  %v763_v54 = vsel %vm759_vm10, %v2296_v48, -inf  ;;  %v843_v47 = vld [vmem:[#allocation7 + $0x18] sm:$0xff] }
 0x127   :  { %761 = vmax.xlane.f32.xlu0 %v760_v50 }
 0x128   :  { %v327_v53 = vpop.f32.mrb[2].mxu0 }
 0x129   :  { %v753_v56 = vsel %vm745_vm12, -1e+09, %v327_v53  ;;  %v1873_v57 = vpop.f32.mrb[3].mxu0 }
 0x12a   :  { %v766_v59 = vsel %vm759_vm10, %v753_v56, -inf  ;;  %v403_v60 = vpop.f32.mrb[2].mxu1 }
 0x12b   :  { %764 = vmax.xlane.f32.xlu0 %v763_v54  ;;  %767 = vmax.xlane.f32.xlu1 %v766_v59  ;;  %v754_v62 = vsel %vm746_vm14, -1e+09, %v403_v60  ;;  %v1878_v63 = vpop.f32.mrb[3].mxu1  ;;  %v846_v59 = vld [vmem:[#allocation7 + $0x30] sm:$0xff] }
 0x12c   :  { %v479_v1 = vpop.f32.mrb[4].mxu0  ;;  %v769_v2 = vsel %vm759_vm10, %v754_v62, -inf }
 0x12d   :  { %v755_v4 = vsel %vm747_vm15, -1e+09, %v479_v1  ;;  %v1883_v5 = vpop.f32.mrb[5].mxu0 }
 0x12e   :  { %v772_v6 = vsel %vm759_vm10, %v755_v4, -inf  ;;  %v555_v7 = vpop.f32.mrb[4].mxu1 }
 0x12f   :  { %770 = vmax.xlane.f32.xlu1 %v769_v2  ;;  %773 = vmax.xlane.f32.xlu0 %v772_v6  ;;  %v756_v8 = vsel %vm748_vm2, -1e+09, %v555_v7  ;;  %v1888_v9 = vpop.f32.mrb[5].mxu1 }
 0x130   :  { %v631_v10 = vpop.f32.mrb[6].mxu0  ;;  %v775_v11 = vsel %vm759_vm10, %v756_v8, -inf }
 0x131   :  { %v757_v12 = vsel %vm749_vm3, -1e+09, %v631_v10  ;;  %v1893_v13 = vpop.f32.mrb[7].mxu0 }
 0x132   :  { %v778_v14 = vsel %vm759_vm10, %v757_v12, -inf  ;;  %v707_v15 = vpop.f32.mrb[6].mxu1 }
 0x133   :  { %776 = vmax.xlane.f32.xlu1 %v775_v11  ;;  %779 = vmax.xlane.f32.xlu0 %v778_v14  ;;  %v758_v16 = vsel %vm750_vm4, -1e+09, %v707_v15  ;;  %v1898_v17 = vpop.f32.mrb[7].mxu1 }
 0x134   :  { %v781_v18 = vsel %vm759_vm10, %v758_v16, -inf }
 0x137   :  { %782 = vmax.xlane.f32.xlu1 %v781_v18 }
 0x1b4   :  { %v762_v21 = vpop.xlane.xlu0 %761 }
 0x1b5   :  { %v784_v22 = vsub.f32 %v751_v46, %v762_v21 }
 0x1b7   :  { %v792_v23 = vmul.f32 1.442695, %v784_v22 }
 0x1b8   :  { %v765_v24 = vpop.xlane.xlu0 %764  ;;  %v768_v25 = vpop.xlane.xlu1 %767 }
 0x1b9   :  { %1956 = vpow2.f32 %v792_v23  ;;  %v785_v26 = vsub.f32 %v2296_v48, %v765_v24  ;;  %v786_v27 = vsub.f32 %v753_v56, %v768_v25 }
 0x1bb   :  { %v794_v28 = vmul.f32 1.442695, %v785_v26  ;;  %v796_v29 = vmul.f32 1.442695, %v786_v27 }
 0x1bc   :  { %v771_v30 = vpop.xlane.xlu1 %770  ;;  %v774_v31 = vpop.xlane.xlu0 %773 }
 0x1bd   :  { %1958 = vpow2.f32 %v794_v28  ;;  %v787_v32 = vsub.f32 %v754_v62, %v771_v30  ;;  %v788_v33 = vsub.f32 %v755_v4, %v774_v31  ;;  %v847_v62 = vld [vmem:[#allocation7 + $0x38] sm:$0xff]  ;;  %v2141_v30 = vmov 1983009808  }
 0x1be   :  { %1960 = vpow2.f32 %v796_v29  ;;  %v1443_v31 = vunpack.c.l.s4 %v2141_v30 }
 0x1bf   :  { %v798_v34 = vmul.f32 1.442695, %v787_v32  ;;  %v800_v35 = vmul.f32 1.442695, %v788_v33  ;;  %v1445_v32 = vlaneseq }
 0x1c0   :  { %v777_v36 = vpop.xlane.xlu1 %776  ;;  %v780_v37 = vpop.xlane.xlu0 %779 }
 0x1c1   :  { %1962 = vpow2.f32 %v798_v34  ;;  %v789_v38 = vsub.f32 %v756_v8, %v777_v36  ;;  %v790_v39 = vsub.f32 %v757_v12, %v780_v37  ;;  %v2142_v34 = vmov 1934713408  }
 0x1c2   :  { %1964 = vpow2.f32 %v800_v35  ;;  %v1507_v35 = vunpack.c.l.s4 %v2142_v34 }
 0x1c3   :  { %v2310_v41 = vpop.eup %1956  ;;  %v802_v42 = vmul.f32 1.442695, %v789_v38  ;;  %v804_v43 = vmul.f32 1.442695, %v790_v39  ;;  %v1444_v38 = vunpack.c.0.s8 %v1443_v31  ;;  %v1446_v39 = vshrl.u32 %v1445_v32, 7 }
 0x1c4   :  { %1902 = vmatmul.mubr.msk.f32.vlgmr.msra.gmra.mrb[8].mxu0 %vm759_vm10, %v2310_v41  ;;  %v783_v44 = vpop.xlane.xlu1 %782  ;;  %v808_v45 = vsel %vm759_vm10, %v2310_v41, 0.0 }
 0x1c5   :  { %1966 = vpow2.f32 %v802_v42  ;;  %v791_v46 = vsub.f32 %v758_v16, %v783_v44  ;;  %809 = vadd.xlane.f32.xlu0 %v808_v45  ;;  %1910 = vmatpush3.msra.mxu0 %v842_v40 }
 0x1c6   :  { %1968 = vpow2.f32 %v804_v43  ;;  %1911 = vmatprep.mubr.msk.f32.mxu0 %vm2139_vm0, %v2138_v0  ;;  %1919 = vmatprep.subr.mxu0 %v2138_v0 }
 0x1c7   :  { %v2319_v48 = vpop.eup %1958  ;;  %v806_v49 = vmul.f32 1.442695, %v791_v46  ;;  %v1508_v46 = vunpack.c.0.s8 %v1507_v35 }
 0x1c8   :  { %v2321_v50 = vpop.eup %1960  ;;  %1907 = vmatmul.mubr.msk.f32.vlgmr.msra.gmra.mrb[8].mxu1 %vm759_vm10, %v2319_v48  ;;  %v811_v51 = vsel %vm759_vm10, %v2319_v48, 0.0 }
 0x1c9   :  { %1970 = vpow2.f32 %v806_v49  ;;  %1912 = vmatmul.mubr.msk.f32.vlgmr.msra.gmra.mrb[10].mxu0 %vm759_vm10, %v2321_v50  ;;  %1915 = vmatpush3.msra.mxu1 %v843_v47  ;;  %v814_v53 = vsel %vm759_vm10, %v2321_v50, 0.0  ;;  %v2365_v47 = vsub.s32 %v1444_v38, %v1446_v39 }
 0x1ca   :  { %812 = vadd.xlane.f32.xlu1 %v811_v51  ;;  %815 = vadd.xlane.f32.xlu0 %v814_v53 }
 0x1cb   :  { %v1963_v54 = vpop.eup %1962  ;;  %1916 = vmatprep.mubr.msk.f32.mxu1 %vm2139_vm0, %v2138_v0  ;;  %1920 = vmatpush3.msra.mxu0 %v844_v52 }
 0x1cc   :  { %v1965_v56 = vpop.eup %1964  ;;  %1921 = vmatprep.mubr.msk.f32.mxu0 %vm2139_vm0, %v2138_v0  ;;  %1917 = vmatmul.mubr.msk.f32.vlgmr.msra.gmra.mrb[10].mxu1 %vm759_vm10, %v1963_v54  ;;  %v817_v57 = vsel %vm759_vm10, %v1963_v54, 0.0 }
 0x1cd   :  { %1922 = vmatmul.mubr.msk.f32.vlgmr.msra.gmra.mrb[12].mxu0 %vm759_vm10, %v1965_v56  ;;  %1924 = vmatprep.subr.mxu1 %v2138_v0  ;;  %v820_v58 = vsel %vm759_vm10, %v1965_v56, 0.0 }
 0x1ce   :  { %1925 = vmatpush3.msra.mxu1 %v845_v55  ;;  %818 = vadd.xlane.f32.xlu1 %v817_v57  ;;  %v2367_v55 = vsub.s32 %v1508_v46, %v1446_v39 }
 0x1cf   :  { %v1967_v60 = vpop.eup %1966  ;;  %821 = vadd.xlane.f32.xlu0 %v820_v58  ;;  %1929 = vmatprep.subr.mxu0 %v2138_v0 }
 0x1d0   :  { %v1969_v61 = vpop.eup %1968  ;;  %1926 = vmatprep.mubr.msk.f32.mxu1 %vm2139_vm0, %v2138_v0  ;;  %1930 = vmatpush3.msra.mxu0 %v846_v59  ;;  %v823_v63 = vsel %vm759_vm10, %v1967_v60, 0.0 }
 0x1d1   :  { %1931 = vmatprep.mubr.msk.f32.mxu0 %vm2139_vm0, %v2138_v0  ;;  %1927 = vmatmul.mubr.msk.f32.vlgmr.msra.gmra.mrb[12].mxu1 %vm759_vm10, %v1967_v60  ;;  %v826_v1 = vsel %vm759_vm10, %v1969_v61, 0.0 }
 0x1d2   :  { %1932 = vmatmul.mubr.msk.f32.vlgmr.msra.gmra.mrb[14].mxu0 %vm759_vm10, %v1969_v61  ;;  %1934 = vmatprep.subr.mxu1 %v2138_v0 }
 0x1d3   :  { %v1971_v2 = vpop.eup %1970  ;;  %1935 = vmatpush3.msra.mxu1 %v847_v62  ;;  %824 = vadd.xlane.f32.xlu1 %v823_v63 }
 0x1d4   :  { %827 = vadd.xlane.f32.xlu0 %v826_v1  ;;  %1936 = vmatprep.mubr.msk.f32.mxu1 %vm2139_vm0, %v2138_v0  ;;  %v829_v3 = vsel %vm759_vm10, %v1971_v2, 0.0 }
 0x1d5   :  { %1937 = vmatmul.mubr.msk.f32.vlgmr.msra.gmra.mrb[14].mxu1 %vm759_vm10, %v1971_v2 }
 0x1d7   :  { %830 = vadd.xlane.f32.xlu1 %v829_v3 }
 0x252   :  { %v810_v4 = vpop.xlane.xlu0 %809 }
 0x253   :  { %1972 = vrcp.f32 %v810_v4 }
 0x257   :  { %v813_v5 = vpop.xlane.xlu1 %812  ;;  %v816_v6 = vpop.xlane.xlu0 %815 }
 0x258   :  { %1974 = vrcp.f32 %v813_v5 }
 0x259   :  { %1976 = vrcp.f32 %v816_v6 }
 0x25b   :  { %v819_v7 = vpop.xlane.xlu1 %818 }
 0x25c   :  { %1978 = vrcp.f32 %v819_v7  ;;  %v822_v8 = vpop.xlane.xlu0 %821 }
 0x25d   :  { %v1973_v9 = vpop.eup %1972  ;;  %1980 = vrcp.f32 %v822_v8 }
 0x25e   :  { %v1746_v10 = vmul.f32 %v1973_v9, %v2310_v41 }
 0x260   :  { %1754 = vst.msk [vmem:[#allocation11] sm:$0xff] %vm759_vm10, %v1746_v10  ;;  %v825_v0 = vpop.xlane.xlu1 %824 }
 0x261   :  { %1982 = vrcp.f32 %v825_v0  ;;  %v828_v11 = vpop.xlane.xlu0 %827 }
 0x262   :  { %v1975_v12 = vpop.eup %1974  ;;  %1984 = vrcp.f32 %v828_v11 }
 0x263   :  { %v1977_v13 = vpop.eup %1976  ;;  %v1747_v14 = vmul.f32 %v1975_v12, %v2319_v48 }
 0x264   :  { %v1748_v15 = vmul.f32 %v1977_v13, %v2321_v50  ;;  %v831_v16 = vpop.xlane.xlu1 %830 }
 0x265   :  { %1755 = vst.msk [vmem:[#allocation11 + $0x8] sm:$0xff] %vm759_vm10, %v1747_v14  ;;  %1986 = vrcp.f32 %v831_v16 }
 0x266   :  { %v1979_v17 = vpop.eup %1978  ;;  %1756 = vst.msk [vmem:[#allocation11 + $0x10] sm:$0xff] %vm759_vm10, %v1748_v15 }
 0x267   :  { %v1981_v18 = vpop.eup %1980  ;;  %v1749_v19 = vmul.f32 %v1979_v17, %v1963_v54 }
 0x268   :  { %v1750_v20 = vmul.f32 %v1981_v18, %v1965_v56 }
 0x269   :  { %1757 = vst.msk [vmem:[#allocation11 + $0x18] sm:$0xff] %vm759_vm10, %v1749_v19 }
 0x26a   :  { %1758 = vst.msk [vmem:[#allocation11 + $0x20] sm:$0xff] %vm759_vm10, %v1750_v20 }
 0x26b   :  { %v1983_v21 = vpop.eup %1982 }
 0x26c   :  { %v1985_v22 = vpop.eup %1984  ;;  %v1751_v23 = vmul.f32 %v1983_v21, %v1967_v60 }
 0x26d   :  { %v1752_v24 = vmul.f32 %v1985_v22, %v1969_v61 }
 0x26e   :  { %1759 = vst.msk [vmem:[#allocation11 + $0x28] sm:$0xff] %vm759_vm10, %v1751_v23 }
 0x26f   :  { %v1987_v25 = vpop.eup %1986  ;;  %1760 = vst.msk [vmem:[#allocation11 + $0x30] sm:$0xff] %vm759_vm10, %v1752_v24 }
 0x270   :  { %v1753_v26 = vmul.f32 %v1987_v25, %v1971_v2 }
 0x272   :  { %1761 = vst.msk [vmem:[#allocation11 + $0x38] sm:$0xff] %vm759_vm10, %v1753_v26 }
 0x297   :  { %v917_v27 = vpop.f32.mrb[8].mxu0 }
 0x298   :  { %v1432_v28 = vmul.f32 %v1973_v9, %v917_v27  ;;  %v1903_v29 = vpop.f32.mrb[9].mxu0 }
 0x29b   :  { %v990_v33 = vpop.f32.mrb[8].mxu1 }
 0x29c   :  { %v1433_v36 = vmul.f32 %v1975_v12, %v990_v33  ;;  %v1063_v37 = vpop.f32.mrb[10].mxu0  ;;  %v1908_v40 = vpop.f32.mrb[9].mxu1 }
 0x29d   :  { %v1434_v41 = vmul.f32 %v1977_v13, %v1063_v37  ;;  %v1913_v42 = vpop.f32.mrb[11].mxu0 }
 0x29f   :  { %v1440_v43 = vcombine.low %v1432_v28, %v1434_v41  ;;  %v1441_v44 = vcombine.high %v1432_v28, %v1434_v41  ;;  %v1136_v45 = vpop.f32.mrb[10].mxu1 }
 0x2a0   :  { %v1435_v48 = vmul.f32 %v1979_v17, %v1136_v45  ;;  %v1209_v49 = vpop.f32.mrb[12].mxu0  ;;  %v1918_v50 = vpop.f32.mrb[11].mxu1 }
 0x2a1   :  { %v1436_v51 = vmul.f32 %v1981_v18, %v1209_v49  ;;  %v1923_v52 = vpop.f32.mrb[13].mxu0  ;;  %v1448_v56 = vrot.slane %v1440_v43, %v2365_v47  ;;  %v1455_v57 = vrot.slane %v1441_v44, %v2365_v47 }
 0x2a2   :  { %v1456_v53 = vcombine.low %v1433_v36, %v1435_v48  ;;  %v1457_v54 = vcombine.high %v1433_v36, %v1435_v48 }
 0x2a4   :  { %v1464_v58 = vrot.slane %v1456_v53, %v2365_v47  ;;  %v1471_v59 = vrot.slane %v1457_v54, %v2365_v47  ;;  %v1282_v60 = vpop.f32.mrb[12].mxu1 }
 0x2a5   :  { %v1437_v61 = vmul.f32 %v1983_v21, %v1282_v60  ;;  %v1355_v62 = vpop.f32.mrb[14].mxu0  ;;  %v1928_v63 = vpop.f32.mrb[13].mxu1 }
 0x2a6   :  { %v1504_v1 = vcombine.low %v1448_v56, %v1464_v58  ;;  %v1505_v2 = vcombine.high %v1448_v56, %v1464_v58  ;;  %v1520_v3 = vcombine.low %v1455_v57, %v1471_v59  ;;  %v1521_v4 = vcombine.high %v1455_v57, %v1471_v59  ;;  %v1933_v5 = vpop.f32.mrb[15].mxu0 }
 0x2a7   :  { %v1438_v6 = vmul.f32 %v1985_v22, %v1355_v62 }
 0x2a8   :  { %v1512_v7 = vrot.slane %v1504_v1, %v2367_v55  ;;  %v1519_v8 = vrot.slane %v1505_v2, %v2367_v55  ;;  %v1528_v9 = vrot.slane %v1520_v3, %v2367_v55  ;;  %v1535_v10 = vrot.slane %v1521_v4, %v2367_v55  ;;  %v1428_v0 = vpop.f32.mrb[14].mxu1 }
 0x2a9   :  { %v1472_v11 = vcombine.low %v1436_v51, %v1438_v6  ;;  %v1473_v12 = vcombine.high %v1436_v51, %v1438_v6  ;;  %v1439_v13 = vmul.f32 %v1987_v25, %v1428_v0  ;;  %v1938_v14 = vpop.f32.mrb[15].mxu1 }
 0x2aa   :  { %v1819_v15 = vcombine.low %v1512_v7, %v1519_v8  ;;  %v1821_v16 = vcombine.high %v1512_v7, %v1519_v8  ;;  %v1823_v17 = vcombine.low %v1528_v9, %v1535_v10  ;;  %v1825_v18 = vcombine.high %v1528_v9, %v1535_v10 }
 0x2ab   :  { %v1488_v19 = vcombine.low %v1437_v61, %v1439_v13  ;;  %v1489_v20 = vcombine.high %v1437_v61, %v1439_v13  ;;  %v1480_v26 = vrot.slane %v1472_v11, %v2365_v47  ;;  %v1487_v27 = vrot.slane %v1473_v12, %v2365_v47 }
 0x2ac   :  { %v1584_v21 = vrot.slane %v1819_v15, %v2365_v47  ;;  %v1600_v22 = vrot.slane %v1821_v16, %v2365_v47  ;;  %v1616_v23 = vrot.slane %v1823_v17, %v2365_v47  ;;  %v1632_v24 = vrot.slane %v1825_v18, %v2365_v47 }
 0x2ad   :  { %v1496_v25 = vrot.slane %v1488_v19, %v2365_v47  ;;  %v1503_v28 = vrot.slane %v1489_v20, %v2365_v47 }
 0x2ae   :  { %v1641_v29 = vcombine.high %v1584_v21, %v1600_v22  ;;  %v1673_v30 = vcombine.high %v1616_v23, %v1632_v24  ;;  %v1640_v31 = vcombine.low %v1584_v21, %v1600_v22  ;;  %v1672_v32 = vcombine.low %v1616_v23, %v1632_v24 }
 0x2af   :  { %v1536_v33 = vcombine.low %v1480_v26, %v1496_v25  ;;  %v1537_v34 = vcombine.high %v1480_v26, %v1496_v25  ;;  %v1552_v35 = vcombine.low %v1487_v27, %v1503_v28  ;;  %v1553_v36 = vcombine.high %v1487_v27, %v1503_v28 }
 0x2b0   :  { %v1655_v37 = vrot.slane %v1641_v29, %v2367_v55  ;;  %v1687_v38 = vrot.slane %v1673_v30, %v2367_v55  ;;  %v1648_v39 = vrot.slane %v1640_v31, %v2367_v55  ;;  %v1680_v40 = vrot.slane %v1672_v32, %v2367_v55 }
 0x2b1   :  { %v1544_v41 = vrot.slane %v1536_v33, %v2367_v55  ;;  %v1551_v42 = vrot.slane %v1537_v34, %v2367_v55  ;;  %v1560_v43 = vrot.slane %v1552_v35, %v2367_v55  ;;  %v1567_v44 = vrot.slane %v1553_v36, %v2367_v55 }
 0x2b2   :  { %v1706_v45 = vcombine.low %v1655_v37, %v1687_v38  ;;  %v1705_v46 = vcombine.high %v1648_v39, %v1680_v40  ;;  %v1704_v48 = vcombine.low %v1648_v39, %v1680_v40  ;;  %v1707_v49 = vcombine.high %v1655_v37, %v1687_v38 }
 0x2b3   :  { %v1820_v50 = vcombine.low %v1544_v41, %v1551_v42  ;;  %v1822_v51 = vcombine.high %v1544_v41, %v1551_v42  ;;  %v1824_v52 = vcombine.low %v1560_v43, %v1567_v44  ;;  %v1826_v53 = vcombine.high %v1560_v43, %v1567_v44 }
 0x2b4   :  { %1717 = vrot.lane.b32.xlu1 %v1706_v45, %s2143_s3  ;;  %1713 = vrot.lane.b32.xlu0 %v1705_v46, %s2136_s2 }
 0x2b5   :  { %v1591_v54 = vrot.slane %v1820_v50, %v2365_v47  ;;  %v1607_v56 = vrot.slane %v1822_v51, %v2365_v47  ;;  %v1623_v57 = vrot.slane %v1824_v52, %v2365_v47  ;;  %v1639_v58 = vrot.slane %v1826_v53, %v2365_v47 }
 0x2b7   :  { %v1656_v59 = vcombine.low %v1591_v54, %v1607_v56  ;;  %v1688_v60 = vcombine.low %v1623_v57, %v1639_v58  ;;  %v1657_v61 = vcombine.high %v1591_v54, %v1607_v56  ;;  %v1689_v62 = vcombine.high %v1623_v57, %v1639_v58 }
 0x2b8   :  { %1721 = vrot.lane.b32.xlu0 %v1707_v49, %s2144_s18 }
 0x2b9   :  { %v1664_v63 = vrot.slane %v1656_v59, %v2367_v55  ;;  %v1696_v1 = vrot.slane %v1688_v60, %v2367_v55  ;;  %v1671_v2 = vrot.slane %v1657_v61, %v2367_v55  ;;  %v1703_v3 = vrot.slane %v1689_v62, %v2367_v55 }
 0x2bb   :  { %v1709_v4 = vcombine.high %v1664_v63, %v1696_v1  ;;  %v1708_v5 = vcombine.low %v1664_v63, %v1696_v1  ;;  %v1710_v47 = vcombine.low %v1671_v2, %v1703_v3  ;;  %v1711_v6 = vcombine.high %v1671_v2, %v1703_v3 }
 0x2bc   :  { %2087 = shalt.err (!%p2084_p8)
}
 0x2bd   :  { %s2088_s25 = scalar_lea.hbm %s2441_s5, 1024 }
 0x2be   :  { %p2089_p9 = scmp.ne.s32.totalorder %s2441_s5, %s2088_s25  ;;  %p2092_p10 = scmp.lt.u32.totalorder %s2088_s25, %s2441_s5 }
 0x2c0   :  { %p2094_p11 = pnand %p2092_p10, %p2089_p9 }
 0x2c2   :  { %2097 = shalt.err (!%p2094_p11)
}
 0x2c3   :  { %1783 = dma.vmem_to_hbm [thread:$0]  %s1778_s20, 1024, %s2441_s5, [#allocation12], %s2132_s30, %s2132_s30, %s2133_s6   ;;  %vm1737_vm0 = vcmask 523264   ;;  %vm1739_vm5 = vcmask 785408  }
 0x2c4   :  { %1725 = vrot.lane.b32.xlu1 %v1709_v4, %s2136_s2  ;;  %s2146_s7 = smov [#allocation10]  }
 0x2c5   :  { %s1768_s5 = sshll.u32 %s2146_s7, 4  ;;  %s1769_s5 = int_to_ptr.vmem [resolvable:$true] %s1768_s5 }
 0x2c6   :  { %s2098_s30 = scalar_lea.vmem %s1769_s5, 256  ;;  %p2103_p13 = scmp.lt.s32.totalorder %s1769_s5, %s1769_s5 }
 0x2c7   :  { %p2099_p12 = scmp.ne.s32.totalorder %s1769_s5, %s2098_s30  ;;  %p2104_p0 = scmp.lt.s32.totalorder %s2098_s30, %s2098_s30 }
 0x2c8   :  { %1729 = vrot.lane.b32.xlu1 %v1710_v47, %s2143_s3 }
 0x2c9   :  { %p2105_p1 = por %p2104_p0, %p2103_p13 }
 0x2cb   :  { %p2106_p2 = pnand %p2105_p1, %p2099_p12 }
 0x2cc   :  { %1733 = vrot.lane.b32.xlu1 %v1711_v6, %s2144_s18 }
 0x326   :  { %v1714_v55 = vpop.permute.xlu0 %1713  ;;  %v1718_v7 = vpop.permute.xlu1 %1717 }
 0x327   :  { %v1736_v8 = vsel %vm102_vm1, %v1704_v48, %v1714_v55 }
 0x328   :  { %v1738_v10 = vsel %vm1737_vm0, %v1736_v8, %v1718_v7 }
 0x32a   :  { %v1722_v9 = vpop.permute.xlu0 %1721 }
 0x32b   :  { %v1740_v0 = vsel %vm1739_vm5, %v1738_v10, %v1722_v9 }
 0x32c   :  { %1744 = vst [vmem:[#allocation10] sm:$0xff] %v1740_v0 }
 0x336   :  { %v1726_v11 = vpop.permute.xlu1 %1725 }
 0x337   :  { %v1741_v13 = vsel %vm102_vm1, %v1708_v5, %v1726_v11 }
 0x33a   :  { %v1730_v12 = vpop.permute.xlu1 %1729 }
 0x33b   :  { %v1742_v14 = vsel %vm1737_vm0, %v1741_v13, %v1730_v12 }
 0x33e   :  { %v1734_v15 = vpop.permute.xlu1 %1733 }
 0x33f   :  { %v1743_v16 = vsel %vm1739_vm5, %v1742_v14, %v1734_v15 }
 0x340   :  { %1745 = vst [vmem:[#allocation10 + $0x8] sm:$0xff] %v1743_v16 }
 0x341   :  { %2109 = shalt.err (!%p2106_p2)
}
 0x342   :  { %s2110_s9 = scalar_lea.hbm %s2440_s4, 256 }
 0x343   :  { %p2111_p3 = scmp.ne.s32.totalorder %s2440_s4, %s2110_s9  ;;  %p2114_p4 = scmp.lt.u32.totalorder %s2110_s9, %s2440_s4 }
 0x345   :  { %p2116_p5 = pnand %p2114_p4, %p2111_p3 }
 0x347   :  { %2119 = shalt.err (!%p2116_p5)
}
 0x348   :  { %1771 = dma.vmem_to_hbm [thread:$0]  %s1769_s5, 256, %s2440_s4, [#allocation4]  }
 0x349   :  { %2126 = dma.done.wait [#allocation4], 256  }
 0x34a   :  { %2127 = vsyncadd [#allocation4], 4294967040 }
 0x34b   :  { %2128 = dma.done.wait [#allocation12], 1024  }
 0x34c   :  { %2129 = vsyncadd [#allocation12], 4294966272 }
 0x34d   :  { %1790 = vsyncpa [#allocation3], 1 }
 0x34e   :  { %1791 = vsyncpa [#allocation6], 1 }
 0x34f   :  { %1792 = vsyncpa [#allocation9], 1 }
 0x350   :  { %1793 = vsyncpa [#allocation4], 1 }
 0x351   :  { %1794 = vsyncpa [#allocation12], 1 }

</bundles_post_ra>
